<compile_context>
chip_gen: v7x
topology: tpu7x:2x2x1
jax: 0.10.0
libtpu: 0.0.40
codegen_flags: <defaults>
</compile_context>

<pallas_src>
import functools
import math

import jax
import jax.numpy as jnp
from jax.experimental import pallas as pl
from jax.experimental.pallas import tpu as pltpu


def _vmem_limit_bytes():
    # Stay well under physical per-core VMEM (64 MiB on v7x, 128 MiB v5e/v6e).
    try:
        cap = int(pltpu.get_tpu_info().vmem_capacity_bytes)
        return int(max(16 << 20, min((cap * 3) // 4, 96 << 20)))
    except Exception:
        return 48 << 20


_VMEM_LIMIT = _vmem_limit_bytes()
_TM = 512       # M (row) tile of the im2col matrix
_TN_MAX = 256   # output-channel tile (matches 256-wide MXU on v6e/v7x)


# ----------------------------------------------------------------------------
# Pallas kernels
# ----------------------------------------------------------------------------
def _fused_matmul_kernel(x_ref, w_ref, scale_ref, shift_ref, o_ref, *, relu):
    acc = jnp.dot(x_ref[...], w_ref[...], preferred_element_type=jnp.float32)
    y = acc * scale_ref[...] + shift_ref[...]
    if relu:
        y = jnp.maximum(y, 0.0)
    o_ref[...] = y


def _fused_matmul_res_kernel(x_ref, w_ref, scale_ref, shift_ref, res_ref, o_ref, *, relu):
    acc = jnp.dot(x_ref[...], w_ref[...], preferred_element_type=jnp.float32)
    y = acc * scale_ref[...] + shift_ref[...] + res_ref[...]
    if relu:
        y = jnp.maximum(y, 0.0)
    o_ref[...] = y


def _maxpool_kernel(x_ref, o_ref):
    # x_ref: (kh*kw, TM, C) window views; reduce over window positions.
    o_ref[...] = jnp.max(x_ref[...], axis=0)


# ----------------------------------------------------------------------------
# Kernel wrappers
# ----------------------------------------------------------------------------
def fused_matmul(x, w, scale, shift, residual=None, relu=True):
    """out = act((x @ w) * scale + shift [+ residual]) via one pallas_call.

    x: (M, K), w: (K, Cout), scale/shift: (1, Cout), residual: (M, Cout)|None.
    Operands are cast to bf16 for the MXU; accumulate/epilogue in f32.
    """
    M, K = x.shape
    _, cout = w.shape

    x = x.astype(jnp.bfloat16)
    w = w.astype(jnp.bfloat16)
    scale = scale.astype(jnp.float32)
    shift = shift.astype(jnp.float32)
    if residual is not None:
        residual = residual.astype(jnp.float32)

    # Channel tile: lane-dense 256/128 when divisible, else full (un-padded)
    # extent -> avoids pad + slice-back HBM copies (cout = 64 / 1000 cases).
    if cout % _TN_MAX == 0:
        tn = _TN_MAX
    elif cout % 128 == 0:
        tn = 128
    else:
        tn = cout
    tm = M if M <= _TM else _TM

    # Outer axis = channel tiles, inner axis = M tiles.  The weight block
    # index is constant across the inner axis, so the (K, tn) slab stays
    # resident in VMEM for all M tiles of a given channel tile.
    grid = (cout // tn, pl.cdiv(M, tm))

    in_specs = [
        pl.BlockSpec((tm, K), lambda j, i: (i, 0)),
        pl.BlockSpec((K, tn), lambda j, i: (0, j)),   # resident across inner i
        pl.BlockSpec((1, tn), lambda j, i: (0, j)),
        pl.BlockSpec((1, tn), lambda j, i: (0, j)),
    ]
    args = [x, w, scale, shift]
    if residual is not None:
        in_specs.append(pl.BlockSpec((tm, tn), lambda j, i: (i, j)))
        args.append(residual)
        kernel = functools.partial(_fused_matmul_res_kernel, relu=relu)
    else:
        kernel = functools.partial(_fused_matmul_kernel, relu=relu)

    bytes_accessed = (x.size * 2 + w.size * 2 + scale.size * 4 + shift.size * 4
                      + M * cout * 4
                      + (residual.size * 4 if residual is not None else 0))
    cost = pl.CostEstimate(flops=2 * M * K * cout, transcendentals=0,
                           bytes_accessed=int(bytes_accessed))

    out = pl.pallas_call(
        kernel,
        out_shape=jax.ShapeDtypeStruct((M, cout), jnp.float32),
        grid=grid,
        in_specs=in_specs,
        out_specs=pl.BlockSpec((tm, tn), lambda j, i: (i, j)),
        compiler_params=pltpu.CompilerParams(
            dimension_semantics=("parallel", "parallel"),
            vmem_limit_bytes=_VMEM_LIMIT,
        ),
        cost_estimate=cost,
    )(*args)
    return out


def _im2col(x, kh, kw, stride, pad):
    """x: (N, H, W, C) -> patches (N*Ho*Wo, kh*kw*C), plus (Ho, Wo)."""
    n, h, w, c = x.shape
    xp = jnp.pad(x, ((0, 0), (pad, pad), (pad, pad), (0, 0)))
    ho = (h + 2 * pad - kh) // stride + 1
    wo = (w + 2 * pad - kw) // stride + 1
    if kh == 1 and kw == 1 and pad == 0:
        patches = xp[:, ::stride, ::stride, :]           # 1x1 conv: plain view
    else:
        # TODO(synk): for KxK convs this still materializes the KxK-expanded
        # patch tensor (in bf16, so half the previous HBM bytes); a manual
        # halo-DMA kernel reading the padded activation directly would remove
        # the remaining expansion.
        cols = []
        for dy in range(kh):
            for dx in range(kw):
                cols.append(xp[:, dy:dy + stride * ho:stride,
                               dx:dx + stride * wo:stride, :])
        patches = jnp.concatenate(cols, axis=-1)         # (N, Ho, Wo, kh*kw*C)
    return patches.reshape(n * ho * wo, kh * kw * c), ho, wo


def conv_bn_act(x, w, scale, shift, *, stride, pad, relu, residual=None):
    """w: (kh, kw, Cin, Cout); x, residual: NHWC (f32)."""
    kh, kw, cin, cout = w.shape
    n = x.shape[0]
    # Cast to bf16 BEFORE im2col so the patch expansion moves half the bytes.
    patches, ho, wo = _im2col(x.astype(jnp.bfloat16), kh, kw, stride, pad)
    wmat = w.reshape(kh * kw * cin, cout).astype(jnp.bfloat16)
    res_flat = residual.reshape(-1, cout) if residual is not None else None
    out = fused_matmul(patches, wmat, scale, shift, residual=res_flat, relu=relu)
    return out.reshape(n, ho, wo, cout)


def maxpool_3x3_s2(x):
    """3x3 stride-2 pad-1 max-pool (NHWC) via a tiled Pallas reduction kernel."""
    n, h, w, c = x.shape
    k, s, pad = 3, 2, 1
    ho = (h + 2 * pad - k) // s + 1
    wo = (w + 2 * pad - k) // s + 1
    xp = jnp.pad(x, ((0, 0), (pad, pad), (pad, pad), (0, 0)),
                 constant_values=-jnp.inf)
    views = [xp[:, dy:dy + s * ho:s, dx:dx + s * wo:s, :].reshape(n * ho * wo, c)
             for dy in range(k) for dx in range(k)]
    stacked = jnp.stack(views, axis=0)  # (9, M, C)
    m = n * ho * wo
    tm = m if m <= _TM else _TM
    out = pl.pallas_call(
        _maxpool_kernel,
        out_shape=jax.ShapeDtypeStruct((m, c), x.dtype),
        grid=(pl.cdiv(m, tm),),
        in_specs=[pl.BlockSpec((k * k, tm, c), lambda i: (0, i, 0))],
        out_specs=pl.BlockSpec((tm, c), lambda i: (i, 0)),
        compiler_params=pltpu.CompilerParams(
            dimension_semantics=("parallel",),
            vmem_limit_bytes=_VMEM_LIMIT,
        ),
    )(stacked)
    return out.reshape(n, ho, wo, c)


# ----------------------------------------------------------------------------
# Deterministic parameter construction (ResNet-50 shapes)
# ----------------------------------------------------------------------------
class _KeyGen:
    def __init__(self, key):
        self._key = key
        self._i = 0

    def __call__(self):
        k = jax.random.fold_in(self._key, self._i)
        self._i += 1
        return k


def _make_conv(kg, cin, cout, k):
    std = math.sqrt(2.0 / (cin * k * k))
    return jax.random.normal(kg(), (k, k, cin, cout), jnp.float32) * std


def _make_bn(kg, c, eps=1e-5):
    gamma = jax.random.uniform(kg(), (c,), minval=0.5, maxval=1.5)
    beta = jax.random.normal(kg(), (c,)) * 0.1
    mean = jax.random.normal(kg(), (c,)) * 0.1
    var = jax.random.uniform(kg(), (c,), minval=0.5, maxval=1.5)
    scale = gamma / jnp.sqrt(var + eps)
    shift = beta - mean * scale
    return scale.reshape(1, c).astype(jnp.float32), shift.reshape(1, c).astype(jnp.float32)


_RESNET50_CFG = [  # (mid, out, num_blocks, stride)
    (64, 256, 3, 1),
    (128, 512, 4, 2),
    (256, 1024, 6, 2),
    (512, 2048, 3, 2),
]


def build_resnet50_params(key):
    kg = _KeyGen(key)
    params = {
        "stem_w": _make_conv(kg, 3, 64, 7),
        "stem_bn": _make_bn(kg, 64),
        "layers": [],
    }
    in_c = 64
    for mid, out_c, n_blocks, stride in _RESNET50_CFG:
        blocks = []
        for b in range(n_blocks):
            blk = {
                "stride": stride if b == 0 else 1,
                "has_down": b == 0,
                "w1": _make_conv(kg, in_c, mid, 1), "bn1": _make_bn(kg, mid),
                "w2": _make_conv(kg, mid, mid, 3), "bn2": _make_bn(kg, mid),
                "w3": _make_conv(kg, mid, out_c, 1), "bn3": _make_bn(kg, out_c),
            }
            if blk["has_down"]:
                blk["wd"] = _make_conv(kg, in_c, out_c, 1)
                blk["bnd"] = _make_bn(kg, out_c)
            blocks.append(blk)
            in_c = out_c
        params["layers"].append(blocks)
    params["fc_w"] = jax.random.normal(kg(), (2048, 1000), jnp.float32) / math.sqrt(2048.0)
    params["fc_b"] = jax.random.normal(kg(), (1, 1000), jnp.float32) * 0.01
    return params


# ----------------------------------------------------------------------------
# ResNet-50 forward (the Encoder(type='resnet50').forward semantics)
# ----------------------------------------------------------------------------
def _bottleneck(x, blk):
    identity = x
    out = conv_bn_act(x, blk["w1"], *blk["bn1"], stride=1, pad=0, relu=True)
    out = conv_bn_act(out, blk["w2"], *blk["bn2"], stride=blk["stride"], pad=1, relu=True)
    if blk["has_down"]:
        identity = conv_bn_act(x, blk["wd"], *blk["bnd"],
                               stride=blk["stride"], pad=0, relu=False)
    # conv3 + BN + residual-add + ReLU fused in one kernel call
    out = conv_bn_act(out, blk["w3"], *blk["bn3"], stride=1, pad=0,
                      relu=True, residual=identity)
    return out


def encoder_forward(params, x_nchw):
    x = jnp.transpose(x_nchw.astype(jnp.float32), (0, 2, 3, 1))  # NCHW -> NHWC
    x = conv_bn_act(x, params["stem_w"], *params["stem_bn"], stride=2, pad=3, relu=True)
    x = maxpool_3x3_s2(x)
    for blocks in params["layers"]:
        for blk in blocks:
            x = _bottleneck(x, blk)
    feat = jnp.mean(x, axis=(1, 2))  # adaptive avg-pool to (1,1)  (glue)
    ones = jnp.ones((1, 1000), jnp.float32)
    logits = fused_matmul(feat, params["fc_w"], ones, params["fc_b"], relu=False)
    return logits  # (N, 1000)


# TODO(synk): only the default `type='resnet50'` backbone is implemented; the
# other Encoder branches require pretrained efficientnet/convnext/vit/clip
# checkpoints and are out of scope for a synthetic kernel.


if __name__ == "__main__":
    key = jax.random.PRNGKey(0)
    k_params, k_x = jax.random.split(key)
    params = build_resnet50_params(k_params)
    # small image consistent with the module's NCHW image input
    x = jax.random.normal(k_x, (2, 3, 32, 32), jnp.float32)

    logits = encoder_forward(params, x)
    logits = jax.block_until_ready(logits)

    assert logits.shape == (2, 1000), logits.shape
    assert logits.dtype == jnp.float32
    print("KERNEL_OK")
</pallas_src>

<mosaic_0001>
module attributes {stable_mosaic.version = 11 : i64} {
  func.func @_fused_matmul_kernel(%arg0: i32, %arg1: i32, %arg2: memref<512x147xbf16, #tpu.memory_space<vmem>>, %arg3: memref<147x64xbf16, #tpu.memory_space<vmem>>, %arg4: memref<1x64xf32, #tpu.memory_space<vmem>>, %arg5: memref<1x64xf32, #tpu.memory_space<vmem>>, %arg6: memref<512x64xf32, #tpu.memory_space<vmem>>) attributes {dimension_semantics = [#tpu.dimension_semantics<parallel>, #tpu.dimension_semantics<parallel>], iteration_bounds = array<i64: 1, 1>, scalar_prefetch = 0 : i64, scratch_operands = 0 : i64, tpu.core_type = #tpu.core_type<tc>, window_params = [{transform_indices = @transform_0, window_bounds = array<i64: 512, 147>}, {transform_indices = @transform_1, window_bounds = array<i64: 147, 64>}, {transform_indices = @transform_2, window_bounds = array<i64: 1, 64>}, {transform_indices = @transform_3, window_bounds = array<i64: 1, 64>}, {transform_indices = @transform_4, window_bounds = array<i64: 512, 64>}]} {
    %c0 = arith.constant 0 : index
    %c0_0 = arith.constant 0 : index
    %0 = vector.load %arg2[%c0, %c0_0] : memref<512x147xbf16, #tpu.memory_space<vmem>>, vector<512x147xbf16>
    %c0_1 = arith.constant 0 : index
    %c0_2 = arith.constant 0 : index
    %1 = vector.load %arg3[%c0_1, %c0_2] : memref<147x64xbf16, #tpu.memory_space<vmem>>, vector<147x64xbf16>
    %cst = arith.constant dense<0.000000e+00> : vector<512x64xf32>
    %2 = tpu.matmul %0, %1, %cst {dimension_numbers = #tpu.dot_dimension_numbers<[1], [0], [0], [1], [0, 0, 1, 1], [], []>} : vector<512x147xbf16>, vector<147x64xbf16>, vector<512x64xf32> -> vector<512x64xf32>
    %c0_3 = arith.constant 0 : index
    %c0_4 = arith.constant 0 : index
    %3 = vector.load %arg4[%c0_3, %c0_4] : memref<1x64xf32, #tpu.memory_space<vmem>>, vector<1x64xf32>
    %4 = vector.broadcast %3 : vector<1x64xf32> to vector<512x64xf32>
    %5 = arith.mulf %2, %4 : vector<512x64xf32>
    %c0_5 = arith.constant 0 : index
    %c0_6 = arith.constant 0 : index
    %6 = vector.load %arg5[%c0_5, %c0_6] : memref<1x64xf32, #tpu.memory_space<vmem>>, vector<1x64xf32>
    %7 = vector.broadcast %6 : vector<1x64xf32> to vector<512x64xf32>
    %8 = arith.addf %5, %7 : vector<512x64xf32>
    %cst_7 = arith.constant 0.000000e+00 : f32
    %9 = vector.broadcast %cst_7 : f32 to vector<512x64xf32>
    %10 = arith.maximumf %8, %9 : vector<512x64xf32>
    %c0_8 = arith.constant 0 : index
    %c0_9 = arith.constant 0 : index
    %11 = vector.load %arg6[%c0_8, %c0_9] : memref<512x64xf32, #tpu.memory_space<vmem>>, vector<512x64xf32>
    tpu.vector_store %arg6[%c0_8, %c0_9], %10 {strides = array<i32>} : memref<512x64xf32, #tpu.memory_space<vmem>>, vector<512x64xf32>,
    return
  }
  func.func @transform_0(%arg0: i32, %arg1: i32) -> (i32, i32) {
    %c0_i32 = arith.constant 0 : i32
    %c0_i32_0 = arith.constant 0 : i32
    return %arg1, %c0_i32 : i32, i32
  }
  func.func @transform_1(%arg0: i32, %arg1: i32) -> (i32, i32) {
    %c0_i32 = arith.constant 0 : i32
    %c0_i32_0 = arith.constant 0 : i32
    return %c0_i32, %arg0 : i32, i32
  }
  func.func @transform_2(%arg0: i32, %arg1: i32) -> (i32, i32) {
    %c0_i32 = arith.constant 0 : i32
    %c0_i32_0 = arith.constant 0 : i32
    return %c0_i32, %arg0 : i32, i32
  }
  func.func @transform_3(%arg0: i32, %arg1: i32) -> (i32, i32) {
    %c0_i32 = arith.constant 0 : i32
    %c0_i32_0 = arith.constant 0 : i32
    return %c0_i32, %arg0 : i32, i32
  }
  func.func @transform_4(%arg0: i32, %arg1: i32) -> (i32, i32) {
    %c0_i32 = arith.constant 0 : i32
    return %arg1, %arg0 : i32, i32
  }
}

</mosaic_0001>

<bundles_post_ra>
// kernel: tpu_custom_call.1
= control target key start
LH: loop header
LB: loop body
LE: loop exit
PB: predicated region body
PF: predicated region fallthrough
CT: control target
= control target key end

     0   :  { %v1350_v0 = vmov 0   ;;  %vm446_vm0 = vcmask 154624   ;;  %vm543_vm1 = vcmask 1040384   ;;  %vm544_vm2 = vcmask 1041408   ;;  %s2025_s1 = inlined_call_operand.vmem [shape: bf16[147,64], index: 1, kind: input, shape index: {}]   ;;  %s2026_s0 = inlined_call_operand.vmem [shape: bf16[512,147], index: 0, kind: input, shape index: {}]   ;;  %s2027_s2 = inlined_call_operand.vmem [shape: f32[1,64], index: 2, kind: input, shape index: {}]   ;;  %s2028_s3 = inlined_call_operand.vmem [shape: f32[1,64], index: 3, kind: input, shape index: {}]   ;;  %s2029_s4 = inlined_call_operand.vmem [shape: f32[512,64], index: 4, kind: output, shape index: {}]  }
   0x1   :  { %550 = vmatprep.subr.bf16.mxu0 %v1350_v0  ;;  %1222 = vmatprep.subr.bf16.mxu1 %v1350_v0  ;;  %v1244_v1 = vld [vmem:[%s2025_s1] sm:$0xff]   ;;  %v1245_v2 = vld [vmem:[%s2025_s1 + $0x8] sm:$0xff]   ;;  %v1246_v3 = vld [vmem:[%s2025_s1 + $0x10] sm:$0xff]   ;;  %v1351_v11 = vmov 65535   ;;  %vm1045_vm3 = vcmask 523264  }
   0x2   :  { %551 = vmatpush1.bf16.msra.mxu0 %v1244_v1  ;;  %1232 = vmatpush1.bf16.msra.mxu1 %v1244_v1  ;;  %v1247_v4 = vld [vmem:[%s2025_s1 + $0x18] sm:$0xff]   ;;  %v1256_v5 = vld [vmem:[%s2026_s0 + $0x4] ss:$8 sps:$4 sm:$0xff]   ;;  %v1250_v9 = vld [vmem:[%s2025_s1 + $0x30] sm:$0xff]   ;;  %v545_v12 = vsel %vm543_vm1, 4294967295, %v1351_v11 }
   0x3   :  { %552 = vmatprep.subr.bf16.mxu0 %v1350_v0  ;;  %1223 = vmatprep.subr.bf16.mxu1 %v1350_v0  ;;  %v1259_v6 = vld [vmem:[%s2026_s0 + $0x104] ss:$8 sps:$4 sm:$0xff]   ;;  %v1251_v10 = vld [vmem:[%s2025_s1 + $0x38] sm:$0xff]   ;;  %v1253_v14 = vld [vmem:[%s2025_s1 + $0x48] ss:$0 sps:$4 sm:$0x33]  }
   0x4   :  { %1188 = vmatprep.mubr.msk.bf16.mxu0 %vm446_vm0, %v1256_v5  ;;  %v1248_v7 = vld [vmem:[%s2025_s1 + $0x20] sm:$0xff]   ;;  %1204 = vmatprep.mubr.msk.bf16.mxu1 %vm446_vm0, %v1259_v6  ;;  %v1249_v8 = vld [vmem:[%s2025_s1 + $0x28] sm:$0xff]   ;;  %v546_v15 = vsel %vm544_vm2, %v545_v12, 0  ;;  %v1260_v19 = vld [vmem:[%s2026_s0 + $0x14] ss:$8 sps:$4 sm:$0xff]  }
   0x5   :  { %v1252_v13 = vld [vmem:[%s2025_s1 + $0x40] sm:$0xff]   ;;  %v548_v16 = vand.u32 %v1253_v14, %v546_v15  ;;  %v1262_v20 = vld [vmem:[%s2026_s0 + $0x114] ss:$8 sps:$4 sm:$0xff]   ;;  %v1264_v21 = vld [vmem:[%s2026_s0 + $0x10] ss:$8 sps:$4 sm:$0xff]  }
   0x6   :  { %553 = vmatpush1.bf16.msra.mxu0 %v1245_v2  ;;  %1233 = vmatpush1.bf16.msra.mxu1 %v1245_v2  ;;  %v1254_v17 = vld [vmem:[%s2026_s0] ss:$8 sps:$4 sm:$0xff]   ;;  %v1265_v22 = vld [vmem:[%s2026_s0 + $0x110] ss:$8 sps:$4 sm:$0xff]   ;;  %v1266_v23 = vld [vmem:[%s2026_s0 + $0x24] ss:$8 sps:$4 sm:$0xff]  }
   0x7   :  { %554 = vmatprep.subr.bf16.mxu0 %v1350_v0  ;;  %1224 = vmatprep.subr.bf16.mxu1 %v1350_v0  ;;  %v1257_v18 = vld [vmem:[%s2026_s0 + $0x100] ss:$8 sps:$4 sm:$0xff]   ;;  %v1268_v24 = vld [vmem:[%s2026_s0 + $0x124] ss:$8 sps:$4 sm:$0xff]   ;;  %v1272_v27 = vld [vmem:[%s2026_s0 + $0x34] ss:$8 sps:$4 sm:$0xff]  }
   0x8   :  { %v1270_v25 = vld [vmem:[%s2026_s0 + $0x20] ss:$8 sps:$4 sm:$0xff]   ;;  %v1274_v28 = vld [vmem:[%s2026_s0 + $0x134] ss:$8 sps:$4 sm:$0xff]   ;;  %v1276_v29 = vld [vmem:[%s2026_s0 + $0x30] ss:$8 sps:$4 sm:$0xff]  }
   0x9   :  { %v1271_v26 = vld [vmem:[%s2026_s0 + $0x120] ss:$8 sps:$4 sm:$0xff]   ;;  %v1277_v30 = vld [vmem:[%s2026_s0 + $0x130] ss:$8 sps:$4 sm:$0xff]   ;;  %v1278_v31 = vld [vmem:[%s2026_s0 + $0x44] ss:$8 sps:$4 sm:$0xff]  }
   0xa   :  { %555 = vmatpush1.bf16.msra.mxu0 %v1246_v3  ;;  %1234 = vmatpush1.bf16.msra.mxu1 %v1246_v3  ;;  %v1280_v32 = vld [vmem:[%s2026_s0 + $0x144] ss:$8 sps:$4 sm:$0xff]   ;;  %v1282_v33 = vld [vmem:[%s2026_s0 + $0x40] ss:$8 sps:$4 sm:$0xff]   ;;  %v1284_v35 = vld [vmem:[%s2026_s0 + $0x54] ss:$8 sps:$4 sm:$0xff]  }
   0xb   :  { %556 = vmatprep.subr.bf16.mxu0 %v1350_v0  ;;  %1225 = vmatprep.subr.bf16.mxu1 %v1350_v0  ;;  %v1283_v34 = vld [vmem:[%s2026_s0 + $0x140] ss:$8 sps:$4 sm:$0xff]   ;;  %v1286_v36 = vld [vmem:[%s2026_s0 + $0x154] ss:$8 sps:$4 sm:$0xff]   ;;  %v1288_v37 = vld [vmem:[%s2026_s0 + $0x50] ss:$8 sps:$4 sm:$0xff]  }
   0xc   :  { %v1289_v38 = vld [vmem:[%s2026_s0 + $0x150] ss:$8 sps:$4 sm:$0xff]   ;;  %v1290_v39 = vld [vmem:[%s2026_s0 + $0x64] ss:$8 sps:$4 sm:$0xff]   ;;  %v1294_v41 = vld [vmem:[%s2026_s0 + $0x60] ss:$8 sps:$4 sm:$0xff]  }
   0xd   :  { %v1292_v40 = vld [vmem:[%s2026_s0 + $0x164] ss:$8 sps:$4 sm:$0xff]   ;;  %v1295_v42 = vld [vmem:[%s2026_s0 + $0x160] ss:$8 sps:$4 sm:$0xff]   ;;  %v1296_v43 = vld [vmem:[%s2026_s0 + $0x74] ss:$8 sps:$4 sm:$0xff]  }
   0xe   :  { %557 = vmatpush1.bf16.msra.mxu0 %v1247_v4  ;;  %1235 = vmatpush1.bf16.msra.mxu1 %v1247_v4  ;;  %v1298_v44 = vld [vmem:[%s2026_s0 + $0x174] ss:$8 sps:$4 sm:$0xff]   ;;  %v1300_v45 = vld [vmem:[%s2026_s0 + $0x70] ss:$8 sps:$4 sm:$0xff]   ;;  %v1302_v47 = vld [vmem:[%s2026_s0 + $0x84] ss:$8 sps:$4 sm:$0xff]  }
   0xf   :  { %558 = vmatprep.subr.bf16.mxu0 %v1350_v0  ;;  %1226 = vmatprep.subr.bf16.mxu1 %v1350_v0  ;;  %v1301_v46 = vld [vmem:[%s2026_s0 + $0x170] ss:$8 sps:$4 sm:$0xff]   ;;  %v1304_v48 = vld [vmem:[%s2026_s0 + $0x184] ss:$8 sps:$4 sm:$0xff]   ;;  %v1306_v49 = vld [vmem:[%s2026_s0 + $0x80] ss:$8 sps:$4 sm:$0xff]  }
  0x10   :  { %v1307_v50 = vld [vmem:[%s2026_s0 + $0x180] ss:$8 sps:$4 sm:$0xff]   ;;  %v1308_v51 = vld [vmem:[%s2026_s0 + $0x94] ss:$8 sps:$4 sm:$0xff]   ;;  %v1312_v53 = vld [vmem:[%s2026_s0 + $0x90] ss:$8 sps:$4 sm:$0xff]  }
  0x11   :  { %v1310_v52 = vld [vmem:[%s2026_s0 + $0x194] ss:$8 sps:$4 sm:$0xff]   ;;  %v1313_v54 = vld [vmem:[%s2026_s0 + $0x190] ss:$8 sps:$4 sm:$0xff]   ;;  %v1314_v55 = vld [vmem:[%s2026_s0 + $0xa4] ss:$8 sps:$4 sm:$0xff]  }
  0x12   :  { %559 = vmatpush1.bf16.msra.mxu0 %v1248_v7  ;;  %1236 = vmatpush1.bf16.msra.mxu1 %v1248_v7  ;;  %v1316_v56 = vld [vmem:[%s2026_s0 + $0x1a4] ss:$8 sps:$4 sm:$0xff]   ;;  %v1318_v57 = vld [vmem:[%s2026_s0 + $0xa0] ss:$8 sps:$4 sm:$0xff]   ;;  %v1320_v59 = vld [vmem:[%s2026_s0 + $0xb4] ss:$8 sps:$4 sm:$0xff]  }
  0x13   :  { %560 = vmatprep.subr.bf16.mxu0 %v1350_v0  ;;  %1227 = vmatprep.subr.bf16.mxu1 %v1350_v0  ;;  %v1319_v58 = vld [vmem:[%s2026_s0 + $0x1a0] ss:$8 sps:$4 sm:$0xff]   ;;  %v1322_v60 = vld [vmem:[%s2026_s0 + $0x1b4] ss:$8 sps:$4 sm:$0xff]   ;;  %v1324_v61 = vld [vmem:[%s2026_s0 + $0xb0] ss:$8 sps:$4 sm:$0xff]  }
  0x14   :  { %v1325_v62 = vld [vmem:[%s2026_s0 + $0x1b0] ss:$8 sps:$4 sm:$0xff]   ;;  %v1326_v63 = vld [vmem:[%s2026_s0 + $0xc4] ss:$8 sps:$4 sm:$0xff]   ;;  %v1330_v1 = vld [vmem:[%s2026_s0 + $0xc0] ss:$8 sps:$4 sm:$0xff]  }
  0x15   :  { %v1331_v2 = vld [vmem:[%s2026_s0 + $0x1c0] ss:$8 sps:$4 sm:$0xff]   ;;  %v1332_v3 = vld [vmem:[%s2026_s0 + $0xd4] ss:$8 sps:$4 sm:$0xff]   ;;  %v1336_v5 = vld [vmem:[%s2026_s0 + $0xd0] ss:$8 sps:$4 sm:$0xff]  }
  0x16   :  { %561 = vmatpush1.bf16.msra.mxu0 %v1249_v8  ;;  %1237 = vmatpush1.bf16.msra.mxu1 %v1249_v8  ;;  %v1334_v4 = vld [vmem:[%s2026_s0 + $0x1d4] ss:$8 sps:$4 sm:$0xff]   ;;  %v1337_v6 = vld [vmem:[%s2026_s0 + $0x1d0] ss:$8 sps:$4 sm:$0xff]   ;;  %v1338_v7 = vld [vmem:[%s2026_s0 + $0xe4] ss:$8 sps:$4 sm:$0xff]  }
  0x17   :  { %562 = vmatprep.subr.bf16.mxu0 %v1350_v0  ;;  %1228 = vmatprep.subr.bf16.mxu1 %v1350_v0  ;;  %v1340_v8 = vld [vmem:[%s2026_s0 + $0x1e4] ss:$8 sps:$4 sm:$0xff]   ;;  %v1344_v11 = vld [vmem:[%s2026_s0 + $0xf4] ss:$8 sps:$4 sm:$0xff]   ;;  %v1349_v14 = vld [vmem:[%s2026_s0 + $0x1f0] ss:$8 sps:$4 sm:$0xff]  }
  0x18   :  { %v1346_v12 = vld [vmem:[%s2026_s0 + $0x1f4] ss:$8 sps:$4 sm:$0xff]   ;;  %v1634_v15 = vld [vmem:[%s2027_s2] ss:$0 sm:$0xff] }
  0x1a   :  { %563 = vmatpush1.bf16.msra.mxu0 %v1250_v9  ;;  %1238 = vmatpush1.bf16.msra.mxu1 %v1250_v9  ;;  %v1342_v9 = vld [vmem:[%s2026_s0 + $0xe0] ss:$8 sps:$4 sm:$0xff]  }
  0x1b   :  { %564 = vmatprep.subr.bf16.mxu0 %v1350_v0  ;;  %1229 = vmatprep.subr.bf16.mxu1 %v1350_v0 }
  0x1e   :  { %565 = vmatpush1.bf16.msra.mxu0 %v1251_v10  ;;  %1239 = vmatpush1.bf16.msra.mxu1 %v1251_v10  ;;  %v1343_v10 = vld [vmem:[%s2026_s0 + $0x1e0] ss:$8 sps:$4 sm:$0xff]  }
  0x1f   :  { %566 = vmatprep.subr.bf16.mxu0 %v1350_v0  ;;  %1230 = vmatprep.subr.bf16.mxu1 %v1350_v0 }
  0x22   :  { %567 = vmatpush1.bf16.msra.mxu0 %v1252_v13  ;;  %1240 = vmatpush1.bf16.msra.mxu1 %v1252_v13  ;;  %v1348_v13 = vld [vmem:[%s2026_s0 + $0xf0] ss:$8 sps:$4 sm:$0xff]  }
  0x23   :  { %568 = vmatprep.subr.bf16.mxu0 %v1350_v0  ;;  %1231 = vmatprep.subr.bf16.mxu1 %v1350_v0  ;;  %v1328_v0 = vld [vmem:[%s2026_s0 + $0x1c4] ss:$8 sps:$4 sm:$0xff]  }
  0x26   :  { %569 = vmatpush1.bf16.msra.mxu0 %v548_v16  ;;  %1241 = vmatpush1.bf16.msra.mxu1 %v548_v16 }
  0x29   :  { %583 = vmatmul.mubr.bf16.vlgmr.msra.gmra.mrb[0].mxu0 %v1254_v17  ;;  %711 = vmatmul.mubr.bf16.vlgmr.msra.gmra.mrb[0].mxu1 %v1257_v18  ;;  %v1639_v17 = vld [vmem:[%s2028_s3] ss:$0 sm:$0xff] }
  0x2a   :  { %1189 = vmatprep.mubr.msk.bf16.mxu0 %vm446_vm0, %v1260_v19  ;;  %1205 = vmatprep.mubr.msk.bf16.mxu1 %vm446_vm0, %v1262_v20 }
  0x31   :  { %591 = vmatmul.mubr.bf16.gmra.mrb[4].mxu0 %v1264_v21  ;;  %719 = vmatmul.mubr.bf16.gmra.mrb[4].mxu1 %v1265_v22 }
  0x32   :  { %1190 = vmatprep.mubr.msk.bf16.mxu0 %vm446_vm0, %v1266_v23  ;;  %1206 = vmatprep.mubr.msk.bf16.mxu1 %vm446_vm0, %v1268_v24 }
  0x39   :  { %599 = vmatmul.mubr.bf16.gmra.mrb[8].mxu0 %v1270_v25  ;;  %727 = vmatmul.mubr.bf16.gmra.mrb[8].mxu1 %v1271_v26 }
  0x3a   :  { %1191 = vmatprep.mubr.msk.bf16.mxu0 %vm446_vm0, %v1272_v27  ;;  %1207 = vmatprep.mubr.msk.bf16.mxu1 %vm446_vm0, %v1274_v28 }
  0x41   :  { %607 = vmatmul.mubr.bf16.gmra.mrb[12].mxu0 %v1276_v29  ;;  %735 = vmatmul.mubr.bf16.gmra.mrb[12].mxu1 %v1277_v30 }
  0x42   :  { %1192 = vmatprep.mubr.msk.bf16.mxu0 %vm446_vm0, %v1278_v31  ;;  %1208 = vmatprep.mubr.msk.bf16.mxu1 %vm446_vm0, %v1280_v32 }
  0x49   :  { %615 = vmatmul.mubr.bf16.gmra.mrb[16].mxu0 %v1282_v33  ;;  %743 = vmatmul.mubr.bf16.gmra.mrb[16].mxu1 %v1283_v34 }
  0x4a   :  { %1193 = vmatprep.mubr.msk.bf16.mxu0 %vm446_vm0, %v1284_v35  ;;  %1209 = vmatprep.mubr.msk.bf16.mxu1 %vm446_vm0, %v1286_v36 }
  0x51   :  { %623 = vmatmul.mubr.bf16.gmra.mrb[20].mxu0 %v1288_v37  ;;  %751 = vmatmul.mubr.bf16.gmra.mrb[20].mxu1 %v1289_v38 }
  0x52   :  { %1194 = vmatprep.mubr.msk.bf16.mxu0 %vm446_vm0, %v1290_v39  ;;  %1210 = vmatprep.mubr.msk.bf16.mxu1 %vm446_vm0, %v1292_v40 }
  0x59   :  { %631 = vmatmul.mubr.bf16.gmra.mrb[24].mxu0 %v1294_v41  ;;  %759 = vmatmul.mubr.bf16.gmra.mrb[24].mxu1 %v1295_v42 }
  0x5a   :  { %1195 = vmatprep.mubr.msk.bf16.mxu0 %vm446_vm0, %v1296_v43  ;;  %1211 = vmatprep.mubr.msk.bf16.mxu1 %vm446_vm0, %v1298_v44 }
  0x61   :  { %639 = vmatmul.mubr.bf16.gmra.mrb[28].mxu0 %v1300_v45  ;;  %767 = vmatmul.mubr.bf16.gmra.mrb[28].mxu1 %v1301_v46 }
  0x62   :  { %1196 = vmatprep.mubr.msk.bf16.mxu0 %vm446_vm0, %v1302_v47  ;;  %1212 = vmatprep.mubr.msk.bf16.mxu1 %vm446_vm0, %v1304_v48 }
  0x69   :  { %647 = vmatmul.mubr.bf16.gmra.mrb[32].mxu0 %v1306_v49  ;;  %775 = vmatmul.mubr.bf16.gmra.mrb[32].mxu1 %v1307_v50 }
  0x6a   :  { %1197 = vmatprep.mubr.msk.bf16.mxu0 %vm446_vm0, %v1308_v51  ;;  %1213 = vmatprep.mubr.msk.bf16.mxu1 %vm446_vm0, %v1310_v52 }
  0x71   :  { %655 = vmatmul.mubr.bf16.gmra.mrb[36].mxu0 %v1312_v53  ;;  %783 = vmatmul.mubr.bf16.gmra.mrb[36].mxu1 %v1313_v54 }
  0x72   :  { %1198 = vmatprep.mubr.msk.bf16.mxu0 %vm446_vm0, %v1314_v55  ;;  %1214 = vmatprep.mubr.msk.bf16.mxu1 %vm446_vm0, %v1316_v56 }
  0x79   :  { %663 = vmatmul.mubr.bf16.gmra.mrb[40].mxu0 %v1318_v57  ;;  %791 = vmatmul.mubr.bf16.gmra.mrb[40].mxu1 %v1319_v58 }
  0x7a   :  { %1199 = vmatprep.mubr.msk.bf16.mxu0 %vm446_vm0, %v1320_v59  ;;  %1215 = vmatprep.mubr.msk.bf16.mxu1 %vm446_vm0, %v1322_v60 }
  0x81   :  { %671 = vmatmul.mubr.bf16.gmra.mrb[44].mxu0 %v1324_v61  ;;  %799 = vmatmul.mubr.bf16.gmra.mrb[44].mxu1 %v1325_v62 }
  0x82   :  { %1200 = vmatprep.mubr.msk.bf16.mxu0 %vm446_vm0, %v1326_v63  ;;  %1216 = vmatprep.mubr.msk.bf16.mxu1 %vm446_vm0, %v1328_v0 }
  0x89   :  { %679 = vmatmul.mubr.bf16.gmra.mrb[48].mxu0 %v1330_v1  ;;  %807 = vmatmul.mubr.bf16.gmra.mrb[48].mxu1 %v1331_v2 }
  0x8a   :  { %1201 = vmatprep.mubr.msk.bf16.mxu0 %vm446_vm0, %v1332_v3  ;;  %1217 = vmatprep.mubr.msk.bf16.mxu1 %vm446_vm0, %v1334_v4 }
  0x91   :  { %687 = vmatmul.mubr.bf16.gmra.mrb[52].mxu0 %v1336_v5  ;;  %815 = vmatmul.mubr.bf16.gmra.mrb[52].mxu1 %v1337_v6 }
  0x92   :  { %1202 = vmatprep.mubr.msk.bf16.mxu0 %vm446_vm0, %v1338_v7  ;;  %1218 = vmatprep.mubr.msk.bf16.mxu1 %vm446_vm0, %v1340_v8 }
  0x99   :  { %695 = vmatmul.mubr.bf16.gmra.mrb[56].mxu0 %v1342_v9  ;;  %823 = vmatmul.mubr.bf16.gmra.mrb[56].mxu1 %v1343_v10 }
  0x9a   :  { %1203 = vmatprep.mubr.msk.bf16.mxu0 %vm446_vm0, %v1344_v11  ;;  %1219 = vmatprep.mubr.msk.bf16.mxu1 %vm446_vm0, %v1346_v12 }
  0xa1   :  { %703 = vmatmul.mubr.bf16.gmra.mrb[60].mxu0 %v1348_v13  ;;  %831 = vmatmul.mubr.bf16.gmra.mrb[60].mxu1 %v1349_v14 }
  0xfc   :  { %v584_v16 = vpop.f32.mrb[0].mxu0  ;;  %v712_v18 = vpop.f32.mrb[0].mxu1 }
  0xfd   :  { %v846_v19 = vmul.f32 %v1634_v15, %v584_v16  ;;  %v878_v20 = vmul.f32 %v1634_v15, %v712_v18  ;;  %v586_v21 = vpop.f32.mrb[1].mxu0  ;;  %v714_v22 = vpop.f32.mrb[1].mxu1 }
  0xfe   :  { %v587_v23 = vpop.f32.mrb[2].mxu0  ;;  %v715_v24 = vpop.f32.mrb[2].mxu1 }
  0xff   :  { %v917_v25 = vadd.f32 %v1639_v17, %v846_v19  ;;  %v949_v26 = vadd.f32 %v1639_v17, %v878_v20  ;;  %v847_v27 = vmul.f32 %v1634_v15, %v587_v23  ;;  %v879_v28 = vmul.f32 %v1634_v15, %v715_v24  ;;  %v589_v29 = vpop.f32.mrb[3].mxu0  ;;  %v717_v30 = vpop.f32.mrb[3].mxu1 }
 0x101   :  { %v981_v31 = vmax.f32 %v917_v25, 0.0  ;;  %v1013_v32 = vmax.f32 %v949_v26, 0.0  ;;  %v918_v33 = vadd.f32 %v1639_v17, %v847_v27  ;;  %v950_v34 = vadd.f32 %v1639_v17, %v879_v28 }
 0x103   :  { %1046 = vst.msk [vmem:[%s2029_s4] sm:$0xff] %vm1045_vm3, %v981_v31  ;;  %1078 = vst.msk [vmem:[%s2029_s4 + $0x100] sm:$0xff] %vm1045_vm3, %v1013_v32  ;;  %v982_v35 = vmax.f32 %v918_v33, 0.0  ;;  %v1014_v36 = vmax.f32 %v950_v34, 0.0 }
 0x104   :  { %v592_v37 = vpop.f32.mrb[4].mxu0  ;;  %v720_v38 = vpop.f32.mrb[4].mxu1 }
 0x105   :  { %1047 = vst.msk [vmem:[%s2029_s4 + $0x8] sm:$0xff] %vm1045_vm3, %v982_v35  ;;  %1079 = vst.msk [vmem:[%s2029_s4 + $0x108] sm:$0xff] %vm1045_vm3, %v1014_v36  ;;  %v848_v39 = vmul.f32 %v1634_v15, %v592_v37  ;;  %v880_v40 = vmul.f32 %v1634_v15, %v720_v38  ;;  %v594_v41 = vpop.f32.mrb[5].mxu0  ;;  %v722_v42 = vpop.f32.mrb[5].mxu1 }
 0x106   :  { %v595_v43 = vpop.f32.mrb[6].mxu0  ;;  %v723_v44 = vpop.f32.mrb[6].mxu1 }
 0x107   :  { %v919_v45 = vadd.f32 %v1639_v17, %v848_v39  ;;  %v951_v46 = vadd.f32 %v1639_v17, %v880_v40  ;;  %v849_v47 = vmul.f32 %v1634_v15, %v595_v43  ;;  %v881_v48 = vmul.f32 %v1634_v15, %v723_v44  ;;  %v597_v49 = vpop.f32.mrb[7].mxu0  ;;  %v725_v50 = vpop.f32.mrb[7].mxu1 }
 0x109   :  { %v983_v51 = vmax.f32 %v919_v45, 0.0  ;;  %v1015_v52 = vmax.f32 %v951_v46, 0.0  ;;  %v920_v53 = vadd.f32 %v1639_v17, %v849_v47  ;;  %v952_v54 = vadd.f32 %v1639_v17, %v881_v48 }
 0x10b   :  { %1048 = vst.msk [vmem:[%s2029_s4 + $0x10] sm:$0xff] %vm1045_vm3, %v983_v51  ;;  %1080 = vst.msk [vmem:[%s2029_s4 + $0x110] sm:$0xff] %vm1045_vm3, %v1015_v52  ;;  %v984_v55 = vmax.f32 %v920_v53, 0.0  ;;  %v1016_v56 = vmax.f32 %v952_v54, 0.0 }
 0x10c   :  { %v600_v57 = vpop.f32.mrb[8].mxu0  ;;  %v728_v58 = vpop.f32.mrb[8].mxu1 }
 0x10d   :  { %1049 = vst.msk [vmem:[%s2029_s4 + $0x18] sm:$0xff] %vm1045_vm3, %v984_v55  ;;  %1081 = vst.msk [vmem:[%s2029_s4 + $0x118] sm:$0xff] %vm1045_vm3, %v1016_v56  ;;  %v850_v59 = vmul.f32 %v1634_v15, %v600_v57  ;;  %v882_v60 = vmul.f32 %v1634_v15, %v728_v58  ;;  %v602_v61 = vpop.f32.mrb[9].mxu0  ;;  %v730_v62 = vpop.f32.mrb[9].mxu1 }
 0x10e   :  { %v603_v63 = vpop.f32.mrb[10].mxu0  ;;  %v731_v0 = vpop.f32.mrb[10].mxu1 }
 0x10f   :  { %v921_v1 = vadd.f32 %v1639_v17, %v850_v59  ;;  %v953_v2 = vadd.f32 %v1639_v17, %v882_v60  ;;  %v851_v3 = vmul.f32 %v1634_v15, %v603_v63  ;;  %v883_v4 = vmul.f32 %v1634_v15, %v731_v0  ;;  %v605_v5 = vpop.f32.mrb[11].mxu0  ;;  %v733_v6 = vpop.f32.mrb[11].mxu1 }
 0x111   :  { %v985_v7 = vmax.f32 %v921_v1, 0.0  ;;  %v1017_v8 = vmax.f32 %v953_v2, 0.0  ;;  %v922_v9 = vadd.f32 %v1639_v17, %v851_v3  ;;  %v954_v10 = vadd.f32 %v1639_v17, %v883_v4 }
 0x113   :  { %1050 = vst.msk [vmem:[%s2029_s4 + $0x20] sm:$0xff] %vm1045_vm3, %v985_v7  ;;  %1082 = vst.msk [vmem:[%s2029_s4 + $0x120] sm:$0xff] %vm1045_vm3, %v1017_v8  ;;  %v986_v11 = vmax.f32 %v922_v9, 0.0  ;;  %v1018_v12 = vmax.f32 %v954_v10, 0.0 }
 0x114   :  { %v608_v13 = vpop.f32.mrb[12].mxu0  ;;  %v736_v14 = vpop.f32.mrb[12].mxu1 }
 0x115   :  { %1051 = vst.msk [vmem:[%s2029_s4 + $0x28] sm:$0xff] %vm1045_vm3, %v986_v11  ;;  %1083 = vst.msk [vmem:[%s2029_s4 + $0x128] sm:$0xff] %vm1045_vm3, %v1018_v12  ;;  %v852_v16 = vmul.f32 %v1634_v15, %v608_v13  ;;  %v884_v18 = vmul.f32 %v1634_v15, %v736_v14  ;;  %v610_v19 = vpop.f32.mrb[13].mxu0  ;;  %v738_v20 = vpop.f32.mrb[13].mxu1 }
 0x116   :  { %v611_v21 = vpop.f32.mrb[14].mxu0  ;;  %v739_v22 = vpop.f32.mrb[14].mxu1 }
 0x117   :  { %v923_v23 = vadd.f32 %v1639_v17, %v852_v16  ;;  %v955_v24 = vadd.f32 %v1639_v17, %v884_v18  ;;  %v853_v25 = vmul.f32 %v1634_v15, %v611_v21  ;;  %v885_v26 = vmul.f32 %v1634_v15, %v739_v22  ;;  %v613_v27 = vpop.f32.mrb[15].mxu0  ;;  %v741_v28 = vpop.f32.mrb[15].mxu1 }
 0x119   :  { %v987_v29 = vmax.f32 %v923_v23, 0.0  ;;  %v1019_v30 = vmax.f32 %v955_v24, 0.0  ;;  %v924_v31 = vadd.f32 %v1639_v17, %v853_v25  ;;  %v956_v32 = vadd.f32 %v1639_v17, %v885_v26 }
 0x11b   :  { %1052 = vst.msk [vmem:[%s2029_s4 + $0x30] sm:$0xff] %vm1045_vm3, %v987_v29  ;;  %1084 = vst.msk [vmem:[%s2029_s4 + $0x130] sm:$0xff] %vm1045_vm3, %v1019_v30  ;;  %v988_v33 = vmax.f32 %v924_v31, 0.0  ;;  %v1020_v34 = vmax.f32 %v956_v32, 0.0 }
 0x11c   :  { %v616_v35 = vpop.f32.mrb[16].mxu0  ;;  %v744_v36 = vpop.f32.mrb[16].mxu1 }
 0x11d   :  { %1053 = vst.msk [vmem:[%s2029_s4 + $0x38] sm:$0xff] %vm1045_vm3, %v988_v33  ;;  %1085 = vst.msk [vmem:[%s2029_s4 + $0x138] sm:$0xff] %vm1045_vm3, %v1020_v34  ;;  %v854_v37 = vmul.f32 %v1634_v15, %v616_v35  ;;  %v886_v38 = vmul.f32 %v1634_v15, %v744_v36  ;;  %v618_v39 = vpop.f32.mrb[17].mxu0  ;;  %v746_v40 = vpop.f32.mrb[17].mxu1 }
 0x11e   :  { %v619_v41 = vpop.f32.mrb[18].mxu0  ;;  %v747_v42 = vpop.f32.mrb[18].mxu1 }
 0x11f   :  { %v925_v43 = vadd.f32 %v1639_v17, %v854_v37  ;;  %v957_v44 = vadd.f32 %v1639_v17, %v886_v38  ;;  %v855_v45 = vmul.f32 %v1634_v15, %v619_v41  ;;  %v887_v46 = vmul.f32 %v1634_v15, %v747_v42  ;;  %v621_v47 = vpop.f32.mrb[19].mxu0  ;;  %v749_v48 = vpop.f32.mrb[19].mxu1 }
 0x121   :  { %v989_v49 = vmax.f32 %v925_v43, 0.0  ;;  %v1021_v50 = vmax.f32 %v957_v44, 0.0  ;;  %v926_v51 = vadd.f32 %v1639_v17, %v855_v45  ;;  %v958_v52 = vadd.f32 %v1639_v17, %v887_v46 }
 0x123   :  { %1054 = vst.msk [vmem:[%s2029_s4 + $0x40] sm:$0xff] %vm1045_vm3, %v989_v49  ;;  %1086 = vst.msk [vmem:[%s2029_s4 + $0x140] sm:$0xff] %vm1045_vm3, %v1021_v50  ;;  %v990_v53 = vmax.f32 %v926_v51, 0.0  ;;  %v1022_v54 = vmax.f32 %v958_v52, 0.0 }
 0x124   :  { %v624_v55 = vpop.f32.mrb[20].mxu0  ;;  %v752_v56 = vpop.f32.mrb[20].mxu1 }
 0x125   :  { %1055 = vst.msk [vmem:[%s2029_s4 + $0x48] sm:$0xff] %vm1045_vm3, %v990_v53  ;;  %1087 = vst.msk [vmem:[%s2029_s4 + $0x148] sm:$0xff] %vm1045_vm3, %v1022_v54  ;;  %v856_v57 = vmul.f32 %v1634_v15, %v624_v55  ;;  %v888_v58 = vmul.f32 %v1634_v15, %v752_v56  ;;  %v626_v59 = vpop.f32.mrb[21].mxu0  ;;  %v754_v60 = vpop.f32.mrb[21].mxu1 }
 0x126   :  { %v627_v61 = vpop.f32.mrb[22].mxu0  ;;  %v755_v62 = vpop.f32.mrb[22].mxu1 }
 0x127   :  { %v927_v63 = vadd.f32 %v1639_v17, %v856_v57  ;;  %v959_v0 = vadd.f32 %v1639_v17, %v888_v58  ;;  %v857_v1 = vmul.f32 %v1634_v15, %v627_v61  ;;  %v889_v2 = vmul.f32 %v1634_v15, %v755_v62  ;;  %v629_v3 = vpop.f32.mrb[23].mxu0  ;;  %v757_v4 = vpop.f32.mrb[23].mxu1 }
 0x129   :  { %v991_v5 = vmax.f32 %v927_v63, 0.0  ;;  %v1023_v6 = vmax.f32 %v959_v0, 0.0  ;;  %v928_v7 = vadd.f32 %v1639_v17, %v857_v1  ;;  %v960_v8 = vadd.f32 %v1639_v17, %v889_v2 }
 0x12b   :  { %1056 = vst.msk [vmem:[%s2029_s4 + $0x50] sm:$0xff] %vm1045_vm3, %v991_v5  ;;  %1088 = vst.msk [vmem:[%s2029_s4 + $0x150] sm:$0xff] %vm1045_vm3, %v1023_v6  ;;  %v992_v9 = vmax.f32 %v928_v7, 0.0  ;;  %v1024_v10 = vmax.f32 %v960_v8, 0.0 }
 0x12c   :  { %v632_v11 = vpop.f32.mrb[24].mxu0  ;;  %v760_v12 = vpop.f32.mrb[24].mxu1 }
 0x12d   :  { %1057 = vst.msk [vmem:[%s2029_s4 + $0x58] sm:$0xff] %vm1045_vm3, %v992_v9  ;;  %1089 = vst.msk [vmem:[%s2029_s4 + $0x158] sm:$0xff] %vm1045_vm3, %v1024_v10  ;;  %v858_v13 = vmul.f32 %v1634_v15, %v632_v11  ;;  %v890_v14 = vmul.f32 %v1634_v15, %v760_v12  ;;  %v634_v16 = vpop.f32.mrb[25].mxu0  ;;  %v762_v18 = vpop.f32.mrb[25].mxu1 }
 0x12e   :  { %v635_v19 = vpop.f32.mrb[26].mxu0  ;;  %v763_v20 = vpop.f32.mrb[26].mxu1 }
 0x12f   :  { %v929_v21 = vadd.f32 %v1639_v17, %v858_v13  ;;  %v961_v22 = vadd.f32 %v1639_v17, %v890_v14  ;;  %v859_v23 = vmul.f32 %v1634_v15, %v635_v19  ;;  %v891_v24 = vmul.f32 %v1634_v15, %v763_v20  ;;  %v637_v25 = vpop.f32.mrb[27].mxu0  ;;  %v765_v26 = vpop.f32.mrb[27].mxu1 }
 0x131   :  { %v993_v27 = vmax.f32 %v929_v21, 0.0  ;;  %v1025_v28 = vmax.f32 %v961_v22, 0.0  ;;  %v930_v29 = vadd.f32 %v1639_v17, %v859_v23  ;;  %v962_v30 = vadd.f32 %v1639_v17, %v891_v24 }
 0x133   :  { %1058 = vst.msk [vmem:[%s2029_s4 + $0x60] sm:$0xff] %vm1045_vm3, %v993_v27  ;;  %1090 = vst.msk [vmem:[%s2029_s4 + $0x160] sm:$0xff] %vm1045_vm3, %v1025_v28  ;;  %v994_v31 = vmax.f32 %v930_v29, 0.0  ;;  %v1026_v32 = vmax.f32 %v962_v30, 0.0 }
 0x134   :  { %v640_v33 = vpop.f32.mrb[28].mxu0  ;;  %v768_v34 = vpop.f32.mrb[28].mxu1 }
 0x135   :  { %1059 = vst.msk [vmem:[%s2029_s4 + $0x68] sm:$0xff] %vm1045_vm3, %v994_v31  ;;  %1091 = vst.msk [vmem:[%s2029_s4 + $0x168] sm:$0xff] %vm1045_vm3, %v1026_v32  ;;  %v860_v35 = vmul.f32 %v1634_v15, %v640_v33  ;;  %v892_v36 = vmul.f32 %v1634_v15, %v768_v34  ;;  %v642_v37 = vpop.f32.mrb[29].mxu0  ;;  %v770_v38 = vpop.f32.mrb[29].mxu1 }
 0x136   :  { %v643_v39 = vpop.f32.mrb[30].mxu0  ;;  %v771_v40 = vpop.f32.mrb[30].mxu1 }
 0x137   :  { %v931_v41 = vadd.f32 %v1639_v17, %v860_v35  ;;  %v963_v42 = vadd.f32 %v1639_v17, %v892_v36  ;;  %v861_v43 = vmul.f32 %v1634_v15, %v643_v39  ;;  %v893_v44 = vmul.f32 %v1634_v15, %v771_v40  ;;  %v645_v45 = vpop.f32.mrb[31].mxu0  ;;  %v773_v46 = vpop.f32.mrb[31].mxu1 }
 0x139   :  { %v995_v47 = vmax.f32 %v931_v41, 0.0  ;;  %v1027_v48 = vmax.f32 %v963_v42, 0.0  ;;  %v932_v49 = vadd.f32 %v1639_v17, %v861_v43  ;;  %v964_v50 = vadd.f32 %v1639_v17, %v893_v44 }
 0x13b   :  { %1060 = vst.msk [vmem:[%s2029_s4 + $0x70] sm:$0xff] %vm1045_vm3, %v995_v47  ;;  %1092 = vst.msk [vmem:[%s2029_s4 + $0x170] sm:$0xff] %vm1045_vm3, %v1027_v48  ;;  %v996_v51 = vmax.f32 %v932_v49, 0.0  ;;  %v1028_v52 = vmax.f32 %v964_v50, 0.0 }
 0x13c   :  { %v648_v53 = vpop.f32.mrb[32].mxu0  ;;  %v776_v54 = vpop.f32.mrb[32].mxu1 }
 0x13d   :  { %1061 = vst.msk [vmem:[%s2029_s4 + $0x78] sm:$0xff] %vm1045_vm3, %v996_v51  ;;  %1093 = vst.msk [vmem:[%s2029_s4 + $0x178] sm:$0xff] %vm1045_vm3, %v1028_v52  ;;  %v862_v55 = vmul.f32 %v1634_v15, %v648_v53  ;;  %v894_v56 = vmul.f32 %v1634_v15, %v776_v54  ;;  %v650_v57 = vpop.f32.mrb[33].mxu0  ;;  %v778_v58 = vpop.f32.mrb[33].mxu1 }
 0x13e   :  { %v651_v59 = vpop.f32.mrb[34].mxu0  ;;  %v779_v60 = vpop.f32.mrb[34].mxu1 }
 0x13f   :  { %v933_v61 = vadd.f32 %v1639_v17, %v862_v55  ;;  %v965_v62 = vadd.f32 %v1639_v17, %v894_v56  ;;  %v863_v63 = vmul.f32 %v1634_v15, %v651_v59  ;;  %v895_v0 = vmul.f32 %v1634_v15, %v779_v60  ;;  %v653_v1 = vpop.f32.mrb[35].mxu0  ;;  %v781_v2 = vpop.f32.mrb[35].mxu1 }
 0x141   :  { %v997_v3 = vmax.f32 %v933_v61, 0.0  ;;  %v1029_v4 = vmax.f32 %v965_v62, 0.0  ;;  %v934_v5 = vadd.f32 %v1639_v17, %v863_v63  ;;  %v966_v6 = vadd.f32 %v1639_v17, %v895_v0 }
 0x143   :  { %1062 = vst.msk [vmem:[%s2029_s4 + $0x80] sm:$0xff] %vm1045_vm3, %v997_v3  ;;  %1094 = vst.msk [vmem:[%s2029_s4 + $0x180] sm:$0xff] %vm1045_vm3, %v1029_v4  ;;  %v998_v7 = vmax.f32 %v934_v5, 0.0  ;;  %v1030_v8 = vmax.f32 %v966_v6, 0.0 }
 0x144   :  { %v656_v9 = vpop.f32.mrb[36].mxu0  ;;  %v784_v10 = vpop.f32.mrb[36].mxu1 }
 0x145   :  { %1063 = vst.msk [vmem:[%s2029_s4 + $0x88] sm:$0xff] %vm1045_vm3, %v998_v7  ;;  %1095 = vst.msk [vmem:[%s2029_s4 + $0x188] sm:$0xff] %vm1045_vm3, %v1030_v8  ;;  %v864_v11 = vmul.f32 %v1634_v15, %v656_v9  ;;  %v896_v12 = vmul.f32 %v1634_v15, %v784_v10  ;;  %v658_v13 = vpop.f32.mrb[37].mxu0  ;;  %v786_v14 = vpop.f32.mrb[37].mxu1 }
 0x146   :  { %v659_v16 = vpop.f32.mrb[38].mxu0  ;;  %v787_v18 = vpop.f32.mrb[38].mxu1 }
 0x147   :  { %v935_v19 = vadd.f32 %v1639_v17, %v864_v11  ;;  %v967_v20 = vadd.f32 %v1639_v17, %v896_v12  ;;  %v865_v21 = vmul.f32 %v1634_v15, %v659_v16  ;;  %v897_v22 = vmul.f32 %v1634_v15, %v787_v18  ;;  %v661_v23 = vpop.f32.mrb[39].mxu0  ;;  %v789_v24 = vpop.f32.mrb[39].mxu1 }
 0x149   :  { %v999_v25 = vmax.f32 %v935_v19, 0.0  ;;  %v1031_v26 = vmax.f32 %v967_v20, 0.0  ;;  %v936_v27 = vadd.f32 %v1639_v17, %v865_v21  ;;  %v968_v28 = vadd.f32 %v1639_v17, %v897_v22 }
 0x14b   :  { %1064 = vst.msk [vmem:[%s2029_s4 + $0x90] sm:$0xff] %vm1045_vm3, %v999_v25  ;;  %1096 = vst.msk [vmem:[%s2029_s4 + $0x190] sm:$0xff] %vm1045_vm3, %v1031_v26  ;;  %v1000_v29 = vmax.f32 %v936_v27, 0.0  ;;  %v1032_v30 = vmax.f32 %v968_v28, 0.0 }
 0x14c   :  { %v664_v31 = vpop.f32.mrb[40].mxu0  ;;  %v792_v32 = vpop.f32.mrb[40].mxu1 }
 0x14d   :  { %1065 = vst.msk [vmem:[%s2029_s4 + $0x98] sm:$0xff] %vm1045_vm3, %v1000_v29  ;;  %1097 = vst.msk [vmem:[%s2029_s4 + $0x198] sm:$0xff] %vm1045_vm3, %v1032_v30  ;;  %v866_v33 = vmul.f32 %v1634_v15, %v664_v31  ;;  %v898_v34 = vmul.f32 %v1634_v15, %v792_v32  ;;  %v666_v35 = vpop.f32.mrb[41].mxu0  ;;  %v794_v36 = vpop.f32.mrb[41].mxu1 }
 0x14e   :  { %v667_v37 = vpop.f32.mrb[42].mxu0  ;;  %v795_v38 = vpop.f32.mrb[42].mxu1 }
 0x14f   :  { %v937_v39 = vadd.f32 %v1639_v17, %v866_v33  ;;  %v969_v40 = vadd.f32 %v1639_v17, %v898_v34  ;;  %v867_v41 = vmul.f32 %v1634_v15, %v667_v37  ;;  %v899_v42 = vmul.f32 %v1634_v15, %v795_v38  ;;  %v669_v43 = vpop.f32.mrb[43].mxu0  ;;  %v797_v44 = vpop.f32.mrb[43].mxu1 }
 0x151   :  { %v1001_v45 = vmax.f32 %v937_v39, 0.0  ;;  %v1033_v46 = vmax.f32 %v969_v40, 0.0  ;;  %v938_v47 = vadd.f32 %v1639_v17, %v867_v41  ;;  %v970_v48 = vadd.f32 %v1639_v17, %v899_v42 }
 0x153   :  { %1066 = vst.msk [vmem:[%s2029_s4 + $0xa0] sm:$0xff] %vm1045_vm3, %v1001_v45  ;;  %1098 = vst.msk [vmem:[%s2029_s4 + $0x1a0] sm:$0xff] %vm1045_vm3, %v1033_v46  ;;  %v1002_v49 = vmax.f32 %v938_v47, 0.0  ;;  %v1034_v50 = vmax.f32 %v970_v48, 0.0 }
 0x154   :  { %v672_v51 = vpop.f32.mrb[44].mxu0  ;;  %v800_v52 = vpop.f32.mrb[44].mxu1 }
 0x155   :  { %1067 = vst.msk [vmem:[%s2029_s4 + $0xa8] sm:$0xff] %vm1045_vm3, %v1002_v49  ;;  %1099 = vst.msk [vmem:[%s2029_s4 + $0x1a8] sm:$0xff] %vm1045_vm3, %v1034_v50  ;;  %v868_v53 = vmul.f32 %v1634_v15, %v672_v51  ;;  %v900_v54 = vmul.f32 %v1634_v15, %v800_v52  ;;  %v674_v55 = vpop.f32.mrb[45].mxu0  ;;  %v802_v56 = vpop.f32.mrb[45].mxu1 }
 0x156   :  { %v675_v57 = vpop.f32.mrb[46].mxu0  ;;  %v803_v58 = vpop.f32.mrb[46].mxu1 }
 0x157   :  { %v939_v59 = vadd.f32 %v1639_v17, %v868_v53  ;;  %v971_v60 = vadd.f32 %v1639_v17, %v900_v54  ;;  %v869_v61 = vmul.f32 %v1634_v15, %v675_v57  ;;  %v901_v62 = vmul.f32 %v1634_v15, %v803_v58  ;;  %v677_v63 = vpop.f32.mrb[47].mxu0  ;;  %v805_v0 = vpop.f32.mrb[47].mxu1 }
 0x159   :  { %v1003_v1 = vmax.f32 %v939_v59, 0.0  ;;  %v1035_v2 = vmax.f32 %v971_v60, 0.0  ;;  %v940_v3 = vadd.f32 %v1639_v17, %v869_v61  ;;  %v972_v4 = vadd.f32 %v1639_v17, %v901_v62 }
 0x15b   :  { %1068 = vst.msk [vmem:[%s2029_s4 + $0xb0] sm:$0xff] %vm1045_vm3, %v1003_v1  ;;  %1100 = vst.msk [vmem:[%s2029_s4 + $0x1b0] sm:$0xff] %vm1045_vm3, %v1035_v2  ;;  %v1004_v5 = vmax.f32 %v940_v3, 0.0  ;;  %v1036_v6 = vmax.f32 %v972_v4, 0.0 }
 0x15c   :  { %v680_v7 = vpop.f32.mrb[48].mxu0  ;;  %v808_v8 = vpop.f32.mrb[48].mxu1 }
 0x15d   :  { %1069 = vst.msk [vmem:[%s2029_s4 + $0xb8] sm:$0xff] %vm1045_vm3, %v1004_v5  ;;  %1101 = vst.msk [vmem:[%s2029_s4 + $0x1b8] sm:$0xff] %vm1045_vm3, %v1036_v6  ;;  %v870_v9 = vmul.f32 %v1634_v15, %v680_v7  ;;  %v902_v10 = vmul.f32 %v1634_v15, %v808_v8  ;;  %v682_v11 = vpop.f32.mrb[49].mxu0  ;;  %v810_v12 = vpop.f32.mrb[49].mxu1 }
 0x15e   :  { %v683_v13 = vpop.f32.mrb[50].mxu0  ;;  %v811_v14 = vpop.f32.mrb[50].mxu1 }
 0x15f   :  { %v941_v16 = vadd.f32 %v1639_v17, %v870_v9  ;;  %v973_v18 = vadd.f32 %v1639_v17, %v902_v10  ;;  %v871_v19 = vmul.f32 %v1634_v15, %v683_v13  ;;  %v903_v20 = vmul.f32 %v1634_v15, %v811_v14  ;;  %v685_v21 = vpop.f32.mrb[51].mxu0  ;;  %v813_v22 = vpop.f32.mrb[51].mxu1 }
 0x161   :  { %v1005_v23 = vmax.f32 %v941_v16, 0.0  ;;  %v1037_v24 = vmax.f32 %v973_v18, 0.0  ;;  %v942_v25 = vadd.f32 %v1639_v17, %v871_v19  ;;  %v974_v26 = vadd.f32 %v1639_v17, %v903_v20 }
 0x163   :  { %1070 = vst.msk [vmem:[%s2029_s4 + $0xc0] sm:$0xff] %vm1045_vm3, %v1005_v23  ;;  %1102 = vst.msk [vmem:[%s2029_s4 + $0x1c0] sm:$0xff] %vm1045_vm3, %v1037_v24  ;;  %v1006_v27 = vmax.f32 %v942_v25, 0.0  ;;  %v1038_v28 = vmax.f32 %v974_v26, 0.0 }
 0x164   :  { %v688_v29 = vpop.f32.mrb[52].mxu0  ;;  %v816_v30 = vpop.f32.mrb[52].mxu1 }
 0x165   :  { %1071 = vst.msk [vmem:[%s2029_s4 + $0xc8] sm:$0xff] %vm1045_vm3, %v1006_v27  ;;  %1103 = vst.msk [vmem:[%s2029_s4 + $0x1c8] sm:$0xff] %vm1045_vm3, %v1038_v28  ;;  %v872_v31 = vmul.f32 %v1634_v15, %v688_v29  ;;  %v904_v32 = vmul.f32 %v1634_v15, %v816_v30  ;;  %v690_v33 = vpop.f32.mrb[53].mxu0  ;;  %v818_v34 = vpop.f32.mrb[53].mxu1 }
 0x166   :  { %v691_v35 = vpop.f32.mrb[54].mxu0  ;;  %v819_v36 = vpop.f32.mrb[54].mxu1 }
 0x167   :  { %v943_v37 = vadd.f32 %v1639_v17, %v872_v31  ;;  %v975_v38 = vadd.f32 %v1639_v17, %v904_v32  ;;  %v873_v39 = vmul.f32 %v1634_v15, %v691_v35  ;;  %v905_v40 = vmul.f32 %v1634_v15, %v819_v36  ;;  %v693_v41 = vpop.f32.mrb[55].mxu0  ;;  %v821_v42 = vpop.f32.mrb[55].mxu1 }
 0x169   :  { %v1007_v43 = vmax.f32 %v943_v37, 0.0  ;;  %v1039_v44 = vmax.f32 %v975_v38, 0.0  ;;  %v944_v45 = vadd.f32 %v1639_v17, %v873_v39  ;;  %v976_v46 = vadd.f32 %v1639_v17, %v905_v40 }
 0x16b   :  { %1072 = vst.msk [vmem:[%s2029_s4 + $0xd0] sm:$0xff] %vm1045_vm3, %v1007_v43  ;;  %1104 = vst.msk [vmem:[%s2029_s4 + $0x1d0] sm:$0xff] %vm1045_vm3, %v1039_v44  ;;  %v1008_v47 = vmax.f32 %v944_v45, 0.0  ;;  %v1040_v48 = vmax.f32 %v976_v46, 0.0 }
 0x16c   :  { %v696_v49 = vpop.f32.mrb[56].mxu0  ;;  %v824_v50 = vpop.f32.mrb[56].mxu1 }
 0x16d   :  { %1073 = vst.msk [vmem:[%s2029_s4 + $0xd8] sm:$0xff] %vm1045_vm3, %v1008_v47  ;;  %1105 = vst.msk [vmem:[%s2029_s4 + $0x1d8] sm:$0xff] %vm1045_vm3, %v1040_v48  ;;  %v874_v51 = vmul.f32 %v1634_v15, %v696_v49  ;;  %v906_v52 = vmul.f32 %v1634_v15, %v824_v50  ;;  %v698_v53 = vpop.f32.mrb[57].mxu0  ;;  %v826_v54 = vpop.f32.mrb[57].mxu1 }
 0x16e   :  { %v699_v55 = vpop.f32.mrb[58].mxu0  ;;  %v827_v56 = vpop.f32.mrb[58].mxu1 }
 0x16f   :  { %v945_v57 = vadd.f32 %v1639_v17, %v874_v51  ;;  %v977_v58 = vadd.f32 %v1639_v17, %v906_v52  ;;  %v875_v59 = vmul.f32 %v1634_v15, %v699_v55  ;;  %v907_v60 = vmul.f32 %v1634_v15, %v827_v56  ;;  %v701_v61 = vpop.f32.mrb[59].mxu0  ;;  %v829_v62 = vpop.f32.mrb[59].mxu1 }
 0x171   :  { %v1009_v63 = vmax.f32 %v945_v57, 0.0  ;;  %v1041_v0 = vmax.f32 %v977_v58, 0.0  ;;  %v946_v1 = vadd.f32 %v1639_v17, %v875_v59  ;;  %v978_v2 = vadd.f32 %v1639_v17, %v907_v60 }
 0x173   :  { %1074 = vst.msk [vmem:[%s2029_s4 + $0xe0] sm:$0xff] %vm1045_vm3, %v1009_v63  ;;  %1106 = vst.msk [vmem:[%s2029_s4 + $0x1e0] sm:$0xff] %vm1045_vm3, %v1041_v0  ;;  %v1010_v3 = vmax.f32 %v946_v1, 0.0  ;;  %v1042_v4 = vmax.f32 %v978_v2, 0.0 }
 0x174   :  { %v704_v5 = vpop.f32.mrb[60].mxu0  ;;  %v832_v6 = vpop.f32.mrb[60].mxu1 }
 0x175   :  { %1075 = vst.msk [vmem:[%s2029_s4 + $0xe8] sm:$0xff] %vm1045_vm3, %v1010_v3  ;;  %1107 = vst.msk [vmem:[%s2029_s4 + $0x1e8] sm:$0xff] %vm1045_vm3, %v1042_v4  ;;  %v876_v7 = vmul.f32 %v1634_v15, %v704_v5  ;;  %v908_v8 = vmul.f32 %v1634_v15, %v832_v6  ;;  %v706_v9 = vpop.f32.mrb[61].mxu0  ;;  %v834_v10 = vpop.f32.mrb[61].mxu1 }
 0x176   :  { %v707_v11 = vpop.f32.mrb[62].mxu0  ;;  %v835_v12 = vpop.f32.mrb[62].mxu1 }
 0x177   :  { %v947_v13 = vadd.f32 %v1639_v17, %v876_v7  ;;  %v979_v14 = vadd.f32 %v1639_v17, %v908_v8  ;;  %v877_v16 = vmul.f32 %v1634_v15, %v707_v11  ;;  %v909_v18 = vmul.f32 %v1634_v15, %v835_v12  ;;  %v709_v19 = vpop.f32.mrb[63].mxu0  ;;  %v837_v20 = vpop.f32.mrb[63].mxu1 }
 0x179   :  { %v1011_v21 = vmax.f32 %v947_v13, 0.0  ;;  %v1043_v22 = vmax.f32 %v979_v14, 0.0  ;;  %v948_v23 = vadd.f32 %v1639_v17, %v877_v16  ;;  %v980_v24 = vadd.f32 %v1639_v17, %v909_v18 }
 0x17b   :  { %1076 = vst.msk [vmem:[%s2029_s4 + $0xf0] sm:$0xff] %vm1045_vm3, %v1011_v21  ;;  %1108 = vst.msk [vmem:[%s2029_s4 + $0x1f0] sm:$0xff] %vm1045_vm3, %v1043_v22  ;;  %v1012_v25 = vmax.f32 %v948_v23, 0.0  ;;  %v1044_v15 = vmax.f32 %v980_v24, 0.0 }
 0x17d   :  { %1077 = vst.msk [vmem:[%s2029_s4 + $0xf8] sm:$0xff] %vm1045_vm3, %v1012_v25  ;;  %1109 = vst.msk [vmem:[%s2029_s4 + $0x1f8] sm:$0xff] %vm1045_vm3, %v1044_v15 }

</bundles_post_ra>
